<compile_context>
chip_gen: v7x
topology: tpu7x:2x2x1
jax: 0.10.0
libtpu: 0.0.40
codegen_flags: <defaults>
</compile_context>

<pallas_src>
import jax
import jax.numpy as jnp
from jax.experimental import pallas as pl
from jax.experimental.pallas import tpu as pltpu

COOR = 3                        # spatial coordinates per joint
NJ = 4                          # joints per group
NG = 5                          # groups (20 joints = 5 * 4)
NF = COOR * NJ                  # 12 feature rows   (row = c*4 + j)
NOUT = (COOR + 1) * (COOR + 1)  # 16 output rows    (row = a*4 + b of the 4x4)


# ---------------------------------------------------------------------------
# Temporal pyramid segments (re-implementation of the missing `sequence()`).
# ---------------------------------------------------------------------------
def sequence(nb_frames):
    half = nb_frames // 2
    third = nb_frames // 3
    return [
        list(range(0, nb_frames)),            # full sequence
        list(range(0, half)),                 # first half
        list(range(half, nb_frames)),         # second half
        list(range(0, third)),                # first third
        list(range(third, 2 * third)),        # middle third
        list(range(2 * third, nb_frames)),    # last third
    ]


def build_gather_indices(nb_frames):
    """Per concatenated segment-frame: center original-frame index and a
    boundary flag (first or last frame of its segment)."""
    idx_c, bnd = [], []
    for s in range(6):
        seg = sequence(nb_frames)[s]
        binf, bsup = min(seg), max(seg)
        length = bsup - binf + 1
        for t in range(length):
            idx_c.append(binf + t)
            bnd.append(1.0 if (t == 0 or t == length - 1) else 0.0)
    return jnp.array(idx_c, jnp.int32), jnp.array(bnd, jnp.float32)


# ---------------------------------------------------------------------------
# Pallas kernel
# ---------------------------------------------------------------------------
def gauss_agg_kernel(yc_ref, w_ref, out_ref):
    # yc_ref : (Bc, 12, Gp) f32   row = c*4 + j (coordinate-major),
    #                             col = group*totL + frame (+ lane padding)
    # w_ref  : (1, Gp)      f32   1.0 at segment-boundary / padding columns
    # out_ref: (Bc, 16, Gp) f32   row = a*4 + b of the 4x4 SPD block
    w = w_ref[...]                      # (1, Gp)
    one_m_w = 1.0 - w
    ones_row = jnp.ones_like(w)         # hoisted (row 15 constant)
    bc = yc_ref.shape[0]
    lanes = yc_ref.shape[2]

    for bi in range(bc):                # small, unrolled at trace time
        yc = yc_ref[bi]                 # (12, Gp)

        # Neighbor frames via lane rotation (XLU).  Garbage only lands on
        # segment-boundary columns (w == 1) where it is multiplied by 0.
        yn1 = pltpu.roll(yc, 1, axis=1)           # one temporal neighbor
        yn2 = pltpu.roll(yc, lanes - 1, axis=1)   # the other neighbor

        mus, d0, d1, d2 = [], [], [], []
        for c in range(COOR):
            lo = c * NJ
            bc_c = yc[lo:lo + NJ, :]              # (4, Gp) center frame
            bn1 = yn1[lo:lo + NJ, :]              # (4, Gp) neighbor
            bn2 = yn2[lo:lo + NJ, :]              # (4, Gp) other neighbor
            j0 = bc_c[0:1, :]
            j1 = bc_c[1:2, :]
            j2 = bc_c[2:3, :]
            j3 = bc_c[3:4, :]
            # mean of the joint-smoothed 4 joints: weights (1/3,1/6,1/6,1/3)
            mu_c = (2.0 * (j0 + j3) + (j1 + j2)) * (1.0 / 6.0)   # (1, Gp)
            mus.append(mu_c)
            d0.append(bc_c - mu_c)                # centered, center frame
            d1.append(bn1 - mu_c)                 # centered, neighbor frame
            d2.append(bn2 - mu_c)                 # centered, other neighbor

        for a in range(COOR):
            for b in range(a, COOR):              # symmetric: compute once
                pc = d0[a] * d0[b]                                  # (4, Gp)
                pint = pc + d1[a] * d1[b] + d2[a] * d2[b]           # (4, Gp)
                cov_bnd = jnp.sum(pc, axis=0, keepdims=True) * (1.0 / NJ)
                cov_int = jnp.sum(pint, axis=0, keepdims=True) * (1.0 / (3.0 * NJ))
                cov_ab = w * cov_bnd + one_m_w * cov_int
                val = cov_ab + mus[a] * mus[b]                      # (1, Gp)
                out_ref[bi, a * 4 + b:a * 4 + b + 1, :] = val
                if b != a:
                    out_ref[bi, b * 4 + a:b * 4 + a + 1, :] = val
            out_ref[bi, a * 4 + COOR:a * 4 + COOR + 1, :] = mus[a]  # elt01
        for b in range(COOR):
            out_ref[bi, 12 + b:13 + b, :] = mus[b]                  # elt10
        out_ref[bi, 15:16, :] = ones_row                            # elt11


# ---------------------------------------------------------------------------
# Wrapper (thin glue: gather segment frames, relayout, call kernel, relayout
# back to the PyTorch (B, 5, L, 4, 4) layout).
# ---------------------------------------------------------------------------
def gauss_agg1_st(inp, t0=1):
    # inp: (batch, nb_frames, joints=20, coor=3, col=1)  -- PyTorch layout.
    del t0  # only used by the original backward pass
    B, T, J, C, col = inp.shape
    assert J == NG * NJ and C == COOR and col == 1
    assert T >= 6, "temporal pyramid requires nb_frames >= 6"

    idx_c, bnd = build_gather_indices(T)
    totL = int(idx_c.shape[0])
    G = NG * totL
    Gp = ((G + 127) // 128) * 128          # lane-dense (multiple of 128)

    x = inp[..., 0].astype(jnp.float32)    # (B, T, 20, 3)
    # Segment-frame gather (6 overlapping contiguous windows) + relayout to
    # coordinate-major rows with frames on the lane axis.
    # TODO(synk): this gather could be fused into the kernel with a
    # per-segment grid + scalar-prefetched offsets; kept as thin XLA glue.
    g = x[:, idx_c]                        # (B, totL, 20, 3)
    g = g.reshape(B, totL, NG, NJ, COOR)
    g = jnp.transpose(g, (0, 4, 3, 2, 1))  # (B, COOR, NJ, NG, totL)
    yc = g.reshape(B, NF, G)               # row = c*4+j, col = group*totL + t
    yc = jnp.pad(yc, ((0, 0), (0, 0), (0, Gp - G)))

    w = jnp.broadcast_to(bnd[None, :], (NG, totL)).reshape(G)
    w = jnp.pad(w, (0, Gp - G), constant_values=1.0).reshape(1, Gp)

    # Batch chunk per grid step: amortize per-step pipeline overhead, keep the
    # double-buffered working set small (fits v5e's 16 MiB scoped VMEM), and
    # keep >= 2 parallel grid steps when possible for v7x's two TensorCores.
    per_batch_bytes = (NF + NOUT) * Gp * 4
    Bc = max(1, min(8, (4 << 20) // per_batch_bytes))
    Bc = min(Bc, B)
    if B >= 2:
        Bc = min(Bc, max(1, B // 2))
    while B % Bc:
        Bc -= 1

    out = pl.pallas_call(
        gauss_agg_kernel,
        out_shape=jax.ShapeDtypeStruct((B, NOUT, Gp), jnp.float32),
        grid=(B // Bc,),
        in_specs=[
            pl.BlockSpec((Bc, NF, Gp), lambda i: (i, 0, 0)),
            pl.BlockSpec((1, Gp), lambda i: (0, 0)),
        ],
        out_specs=pl.BlockSpec((Bc, NOUT, Gp), lambda i: (i, 0, 0)),
        compiler_params=pltpu.CompilerParams(dimension_semantics=("parallel",)),
    )(yc, w)

    out = out[:, :, :G]                              # drop lane padding
    out = out.reshape(B, COOR + 1, COOR + 1, NG, totL)
    out = jnp.transpose(out, (0, 3, 4, 1, 2))        # (B, 5, totL, 4, 4)
    return out


# ---------------------------------------------------------------------------
# Pure-JAX reference mirroring the PyTorch forward exactly (for verification).
# ---------------------------------------------------------------------------
def reference(inp):
    B, T, J, C, col = inp.shape
    inp = inp.astype(jnp.float32)

    def mt(a):
        return jnp.swapaxes(a, -1, -2)

    outs = []
    for s in range(6):
        seg = sequence(T)[s]
        binf, bsup = min(seg), max(seg)
        L = bsup - binf + 1
        x = jnp.transpose(inp[:, binf:bsup + 1], (0, 2, 1, 3, 4))
        x = x.reshape(B, NG, NJ, L, C, col)
        y = x
        mid = (x[:, :, 1:-1] + x[:, :, :-2] + x[:, :, 2:]) / 3.0
        xs = jnp.concatenate([x[:, :, :1], mid, x[:, :, -1:]], axis=2)
        mu = xs.mean(2)                       # (B,5,L,C,1)
        m = mu[:, :, None]                    # (B,5,1,L,C,1)
        xm = y[:, :, :, :-2] - m[:, :, :, 1:-1]
        x0 = y - m
        xp = y[:, :, :, 2:] - m[:, :, :, 1:-1]
        cov = jnp.zeros((B, NG, L, C, C), jnp.float32)
        x0i = x0[:, :, :, 1:-1]
        cov_int = ((xm @ mt(xm) + x0i @ mt(x0i) + xp @ mt(xp)) / 3.0).mean(2)
        cov = cov.at[:, :, 1:-1].set(cov_int)
        stride = bsup - binf
        x0b = x0[:, :, :, ::stride]
        cov = cov.at[:, :, ::stride].set((x0b @ mt(x0b)).mean(2))
        elt00 = cov + mu @ mt(mu)
        elt01 = mu
        elt10 = mt(mu)
        elt11 = jnp.ones((B, NG, L, 1, 1), jnp.float32)
        top = jnp.concatenate([elt00, elt01], -1)
        bot = jnp.concatenate([elt10, elt11], -1)
        outs.append(jnp.concatenate([top, bot], -2))
    return jnp.concatenate(outs, 2)


if __name__ == "__main__":
    key = jax.random.PRNGKey(0)
    B, T = 2, 12                      # small shapes: batch=2, nb_frames=12
    inp = jax.random.normal(key, (B, T, 20, 3, 1), jnp.float32)

    out = jax.jit(gauss_agg1_st)(inp)
    out = jax.block_until_ready(out)

    ref = reference(inp)
    assert out.shape == ref.shape, (out.shape, ref.shape)
    max_err = float(jnp.max(jnp.abs(out - ref)))
    if not jnp.allclose(out, ref, atol=1e-3, rtol=1e-3):
        raise AssertionError(f"kernel/reference mismatch, max abs err = {max_err}")
    print("KERNEL_OK")
</pallas_src>

<mosaic_0001>
module attributes {stable_mosaic.version = 11 : i64} {
  func.func @gauss_agg_kernel(%arg0: i32, %arg1: memref<1x12x256xf32, #tpu.memory_space<vmem>>, %arg2: memref<1x256xf32, #tpu.memory_space<vmem>>, %arg3: memref<1x16x256xf32, #tpu.memory_space<vmem>>) attributes {dimension_semantics = [#tpu.dimension_semantics<parallel>], iteration_bounds = array<i64: 2>, scalar_prefetch = 0 : i64, scratch_operands = 0 : i64, tpu.core_type = #tpu.core_type<tc>, window_params = [{transform_indices = @transform_0, window_bounds = array<i64: 1, 12, 256>}, {pipeline_mode = #tpu.pipeline_mode<synchronous>, transform_indices = @transform_1, window_bounds = array<i64: 1, 256>}, {transform_indices = @transform_2, window_bounds = array<i64: 1, 16, 256>}]} {
    %c0 = arith.constant 0 : index
    %c0_0 = arith.constant 0 : index
    %0 = vector.load %arg2[%c0, %c0_0] : memref<1x256xf32, #tpu.memory_space<vmem>>, vector<1x256xf32>
    %cst = arith.constant 1.000000e+00 : f32
    %1 = vector.broadcast %cst : f32 to vector<1x256xf32>
    %2 = arith.subf %1, %0 : vector<1x256xf32>
    %cst_1 = arith.constant 1.000000e+00 : f32
    %3 = vector.broadcast %cst_1 : f32 to vector<1x256xf32>
    %c0_2 = arith.constant 0 : index
    %c0_3 = arith.constant 0 : index
    %c0_4 = arith.constant 0 : index
    %4 = vector.load %arg1[%c0_2, %c0_3, %c0_4] : memref<1x12x256xf32, #tpu.memory_space<vmem>>, vector<1x12x256xf32>
    %5 = vector.shape_cast %4 : vector<1x12x256xf32> to vector<12x256xf32>
    %c1_i32 = arith.constant 1 : i32
    %6 = tpu.dynamic_rotate %5 by %c1_i32 dim 1 : vector<12x256xf32>, i32 -> vector<12x256xf32>
    %c255_i32 = arith.constant 255 : i32
    %7 = tpu.dynamic_rotate %5 by %c255_i32 dim 1 : vector<12x256xf32>, i32 -> vector<12x256xf32>
    %8 = vector.extract_strided_slice %5 {offsets = [0, 0], sizes = [4, 256], strides = [1, 1]} : vector<12x256xf32> to vector<4x256xf32>
    %9 = vector.extract_strided_slice %6 {offsets = [0, 0], sizes = [4, 256], strides = [1, 1]} : vector<12x256xf32> to vector<4x256xf32>
    %10 = vector.extract_strided_slice %7 {offsets = [0, 0], sizes = [4, 256], strides = [1, 1]} : vector<12x256xf32> to vector<4x256xf32>
    %11 = vector.extract_strided_slice %8 {offsets = [0, 0], sizes = [1, 256], strides = [1, 1]} : vector<4x256xf32> to vector<1x256xf32>
    %12 = vector.extract_strided_slice %8 {offsets = [1, 0], sizes = [1, 256], strides = [1, 1]} : vector<4x256xf32> to vector<1x256xf32>
    %13 = vector.extract_strided_slice %8 {offsets = [2, 0], sizes = [1, 256], strides = [1, 1]} : vector<4x256xf32> to vector<1x256xf32>
    %14 = vector.extract_strided_slice %8 {offsets = [3, 0], sizes = [1, 256], strides = [1, 1]} : vector<4x256xf32> to vector<1x256xf32>
    %15 = arith.addf %11, %14 : vector<1x256xf32>
    %cst_5 = arith.constant 2.000000e+00 : f32
    %16 = vector.broadcast %cst_5 : f32 to vector<1x256xf32>
    %17 = arith.mulf %16, %15 : vector<1x256xf32>
    %18 = arith.addf %12, %13 : vector<1x256xf32>
    %19 = arith.addf %17, %18 : vector<1x256xf32>
    %cst_6 = arith.constant 0.166666672 : f32
    %20 = vector.broadcast %cst_6 : f32 to vector<1x256xf32>
    %21 = arith.mulf %19, %20 : vector<1x256xf32>
    %22 = vector.broadcast %21 : vector<1x256xf32> to vector<4x256xf32>
    %23 = arith.subf %8, %22 : vector<4x256xf32>
    %24 = vector.broadcast %21 : vector<1x256xf32> to vector<4x256xf32>
    %25 = arith.subf %9, %24 : vector<4x256xf32>
    %26 = vector.broadcast %21 : vector<1x256xf32> to vector<4x256xf32>
    %27 = arith.subf %10, %26 : vector<4x256xf32>
    %28 = vector.extract_strided_slice %5 {offsets = [4, 0], sizes = [4, 256], strides = [1, 1]} : vector<12x256xf32> to vector<4x256xf32>
    %29 = vector.extract_strided_slice %6 {offsets = [4, 0], sizes = [4, 256], strides = [1, 1]} : vector<12x256xf32> to vector<4x256xf32>
    %30 = vector.extract_strided_slice %7 {offsets = [4, 0], sizes = [4, 256], strides = [1, 1]} : vector<12x256xf32> to vector<4x256xf32>
    %31 = vector.extract_strided_slice %28 {offsets = [0, 0], sizes = [1, 256], strides = [1, 1]} : vector<4x256xf32> to vector<1x256xf32>
    %32 = vector.extract_strided_slice %28 {offsets = [1, 0], sizes = [1, 256], strides = [1, 1]} : vector<4x256xf32> to vector<1x256xf32>
    %33 = vector.extract_strided_slice %28 {offsets = [2, 0], sizes = [1, 256], strides = [1, 1]} : vector<4x256xf32> to vector<1x256xf32>
    %34 = vector.extract_strided_slice %28 {offsets = [3, 0], sizes = [1, 256], strides = [1, 1]} : vector<4x256xf32> to vector<1x256xf32>
    %35 = arith.addf %31, %34 : vector<1x256xf32>
    %cst_7 = arith.constant 2.000000e+00 : f32
    %36 = vector.broadcast %cst_7 : f32 to vector<1x256xf32>
    %37 = arith.mulf %36, %35 : vector<1x256xf32>
    %38 = arith.addf %32, %33 : vector<1x256xf32>
    %39 = arith.addf %37, %38 : vector<1x256xf32>
    %cst_8 = arith.constant 0.166666672 : f32
    %40 = vector.broadcast %cst_8 : f32 to vector<1x256xf32>
    %41 = arith.mulf %39, %40 : vector<1x256xf32>
    %42 = vector.broadcast %41 : vector<1x256xf32> to vector<4x256xf32>
    %43 = arith.subf %28, %42 : vector<4x256xf32>
    %44 = vector.broadcast %41 : vector<1x256xf32> to vector<4x256xf32>
    %45 = arith.subf %29, %44 : vector<4x256xf32>
    %46 = vector.broadcast %41 : vector<1x256xf32> to vector<4x256xf32>
    %47 = arith.subf %30, %46 : vector<4x256xf32>
    %48 = vector.extract_strided_slice %5 {offsets = [8, 0], sizes = [4, 256], strides = [1, 1]} : vector<12x256xf32> to vector<4x256xf32>
    %49 = vector.extract_strided_slice %6 {offsets = [8, 0], sizes = [4, 256], strides = [1, 1]} : vector<12x256xf32> to vector<4x256xf32>
    %50 = vector.extract_strided_slice %7 {offsets = [8, 0], sizes = [4, 256], strides = [1, 1]} : vector<12x256xf32> to vector<4x256xf32>
    %51 = vector.extract_strided_slice %48 {offsets = [0, 0], sizes = [1, 256], strides = [1, 1]} : vector<4x256xf32> to vector<1x256xf32>
    %52 = vector.extract_strided_slice %48 {offsets = [1, 0], sizes = [1, 256], strides = [1, 1]} : vector<4x256xf32> to vector<1x256xf32>
    %53 = vector.extract_strided_slice %48 {offsets = [2, 0], sizes = [1, 256], strides = [1, 1]} : vector<4x256xf32> to vector<1x256xf32>
    %54 = vector.extract_strided_slice %48 {offsets = [3, 0], sizes = [1, 256], strides = [1, 1]} : vector<4x256xf32> to vector<1x256xf32>
    %55 = arith.addf %51, %54 : vector<1x256xf32>
    %cst_9 = arith.constant 2.000000e+00 : f32
    %56 = vector.broadcast %cst_9 : f32 to vector<1x256xf32>
    %57 = arith.mulf %56, %55 : vector<1x256xf32>
    %58 = arith.addf %52, %53 : vector<1x256xf32>
    %59 = arith.addf %57, %58 : vector<1x256xf32>
    %cst_10 = arith.constant 0.166666672 : f32
    %60 = vector.broadcast %cst_10 : f32 to vector<1x256xf32>
    %61 = arith.mulf %59, %60 : vector<1x256xf32>
    %62 = vector.broadcast %61 : vector<1x256xf32> to vector<4x256xf32>
    %63 = arith.subf %48, %62 : vector<4x256xf32>
    %64 = vector.broadcast %61 : vector<1x256xf32> to vector<4x256xf32>
    %65 = arith.subf %49, %64 : vector<4x256xf32>
    %66 = vector.broadcast %61 : vector<1x256xf32> to vector<4x256xf32>
    %67 = arith.subf %50, %66 : vector<4x256xf32>
    %68 = arith.mulf %23, %23 : vector<4x256xf32>
    %69 = arith.mulf %25, %25 : vector<4x256xf32>
    %70 = arith.addf %68, %69 : vector<4x256xf32>
    %71 = arith.mulf %27, %27 : vector<4x256xf32>
    %72 = arith.addf %70, %71 : vector<4x256xf32>
    %cst_11 = arith.constant dense<0.000000e+00> : vector<256xf32>
    %73 = vector.multi_reduction <add>, %68, %cst_11 [0] : vector<4x256xf32> to vector<256xf32>
    %74 = vector.shape_cast %73 : vector<256xf32> to vector<1x256xf32>
    %cst_12 = arith.constant 2.500000e-01 : f32
    %75 = vector.broadcast %cst_12 : f32 to vector<1x256xf32>
    %76 = arith.mulf %74, %75 : vector<1x256xf32>
    %cst_13 = arith.constant dense<0.000000e+00> : vector<256xf32>
    %77 = vector.multi_reduction <add>, %72, %cst_13 [0] : vector<4x256xf32> to vector<256xf32>
    %78 = vector.shape_cast %77 : vector<256xf32> to vector<1x256xf32>
    %cst_14 = arith.constant 0.0833333358 : f32
    %79 = vector.broadcast %cst_14 : f32 to vector<1x256xf32>
    %80 = arith.mulf %78, %79 : vector<1x256xf32>
    %81 = arith.mulf %0, %76 : vector<1x256xf32>
    %82 = arith.mulf %2, %80 : vector<1x256xf32>
    %83 = arith.addf %81, %82 : vector<1x256xf32>
    %84 = arith.mulf %21, %21 : vector<1x256xf32>
    %85 = arith.addf %83, %84 : vector<1x256xf32>
    %c0_15 = arith.constant 0 : index
    %c0_16 = arith.constant 0 : index
    %c0_17 = arith.constant 0 : index
    %86 = vector.load %arg3[%c0_15, %c0_16, %c0_17] : memref<1x16x256xf32, #tpu.memory_space<vmem>>, vector<1x1x256xf32>
    %87 = vector.shape_cast %86 : vector<1x1x256xf32> to vector<1x256xf32>
    %88 = vector.shape_cast %85 : vector<1x256xf32> to vector<1x1x256xf32>
    tpu.vector_store %arg3[%c0_15, %c0_16, %c0_17], %88 {strides = array<i32>} : memref<1x16x256xf32, #tpu.memory_space<vmem>>, vector<1x1x256xf32>,
    %89 = arith.mulf %23, %43 : vector<4x256xf32>
    %90 = arith.mulf %25, %45 : vector<4x256xf32>
    %91 = arith.addf %89, %90 : vector<4x256xf32>
    %92 = arith.mulf %27, %47 : vector<4x256xf32>
    %93 = arith.addf %91, %92 : vector<4x256xf32>
    %cst_18 = arith.constant dense<0.000000e+00> : vector<256xf32>
    %94 = vector.multi_reduction <add>, %89, %cst_18 [0] : vector<4x256xf32> to vector<256xf32>
    %95 = vector.shape_cast %94 : vector<256xf32> to vector<1x256xf32>
    %cst_19 = arith.constant 2.500000e-01 : f32
    %96 = vector.broadcast %cst_19 : f32 to vector<1x256xf32>
    %97 = arith.mulf %95, %96 : vector<1x256xf32>
    %cst_20 = arith.constant dense<0.000000e+00> : vector<256xf32>
    %98 = vector.multi_reduction <add>, %93, %cst_20 [0] : vector<4x256xf32> to vector<256xf32>
    %99 = vector.shape_cast %98 : vector<256xf32> to vector<1x256xf32>
    %cst_21 = arith.constant 0.0833333358 : f32
    %100 = vector.broadcast %cst_21 : f32 to vector<1x256xf32>
    %101 = arith.mulf %99, %100 : vector<1x256xf32>
    %102 = arith.mulf %0, %97 : vector<1x256xf32>
    %103 = arith.mulf %2, %101 : vector<1x256xf32>
    %104 = arith.addf %102, %103 : vector<1x256xf32>
    %105 = arith.mulf %21, %41 : vector<1x256xf32>
    %106 = arith.addf %104, %105 : vector<1x256xf32>
    %c0_22 = arith.constant 0 : index
    %c1 = arith.constant 1 : index
    %c0_23 = arith.constant 0 : index
    %107 = vector.load %arg3[%c0_22, %c1, %c0_23] : memref<1x16x256xf32, #tpu.memory_space<vmem>>, vector<1x1x256xf32>
    %108 = vector.shape_cast %107 : vector<1x1x256xf32> to vector<1x256xf32>
    %109 = vector.shape_cast %106 : vector<1x256xf32> to vector<1x1x256xf32>
    tpu.vector_store %arg3[%c0_22, %c1, %c0_23], %109 {strides = array<i32>} : memref<1x16x256xf32, #tpu.memory_space<vmem>>, vector<1x1x256xf32>,
    %c0_24 = arith.constant 0 : index
    %c4 = arith.constant 4 : index
    %c0_25 = arith.constant 0 : index
    %110 = vector.load %arg3[%c0_24, %c4, %c0_25] : memref<1x16x256xf32, #tpu.memory_space<vmem>>, vector<1x1x256xf32>
    %111 = vector.shape_cast %110 : vector<1x1x256xf32> to vector<1x256xf32>
    %112 = vector.shape_cast %106 : vector<1x256xf32> to vector<1x1x256xf32>
    tpu.vector_store %arg3[%c0_24, %c4, %c0_25], %112 {strides = array<i32>} : memref<1x16x256xf32, #tpu.memory_space<vmem>>, vector<1x1x256xf32>,
    %113 = arith.mulf %23, %63 : vector<4x256xf32>
    %114 = arith.mulf %25, %65 : vector<4x256xf32>
    %115 = arith.addf %113, %114 : vector<4x256xf32>
    %116 = arith.mulf %27, %67 : vector<4x256xf32>
    %117 = arith.addf %115, %116 : vector<4x256xf32>
    %cst_26 = arith.constant dense<0.000000e+00> : vector<256xf32>
    %118 = vector.multi_reduction <add>, %113, %cst_26 [0] : vector<4x256xf32> to vector<256xf32>
    %119 = vector.shape_cast %118 : vector<256xf32> to vector<1x256xf32>
    %cst_27 = arith.constant 2.500000e-01 : f32
    %120 = vector.broadcast %cst_27 : f32 to vector<1x256xf32>
    %121 = arith.mulf %119, %120 : vector<1x256xf32>
    %cst_28 = arith.constant dense<0.000000e+00> : vector<256xf32>
    %122 = vector.multi_reduction <add>, %117, %cst_28 [0] : vector<4x256xf32> to vector<256xf32>
    %123 = vector.shape_cast %122 : vector<256xf32> to vector<1x256xf32>
    %cst_29 = arith.constant 0.0833333358 : f32
    %124 = vector.broadcast %cst_29 : f32 to vector<1x256xf32>
    %125 = arith.mulf %123, %124 : vector<1x256xf32>
    %126 = arith.mulf %0, %121 : vector<1x256xf32>
    %127 = arith.mulf %2, %125 : vector<1x256xf32>
    %128 = arith.addf %126, %127 : vector<1x256xf32>
    %129 = arith.mulf %21, %61 : vector<1x256xf32>
    %130 = arith.addf %128, %129 : vector<1x256xf32>
    %c0_30 = arith.constant 0 : index
    %c2 = arith.constant 2 : index
    %c0_31 = arith.constant 0 : index
    %131 = vector.load %arg3[%c0_30, %c2, %c0_31] : memref<1x16x256xf32, #tpu.memory_space<vmem>>, vector<1x1x256xf32>
    %132 = vector.shape_cast %131 : vector<1x1x256xf32> to vector<1x256xf32>
    %133 = vector.shape_cast %130 : vector<1x256xf32> to vector<1x1x256xf32>
    tpu.vector_store %arg3[%c0_30, %c2, %c0_31], %133 {strides = array<i32>} : memref<1x16x256xf32, #tpu.memory_space<vmem>>, vector<1x1x256xf32>,
    %c0_32 = arith.constant 0 : index
    %c8 = arith.constant 8 : index
    %c0_33 = arith.constant 0 : index
    %134 = vector.load %arg3[%c0_32, %c8, %c0_33] : memref<1x16x256xf32, #tpu.memory_space<vmem>>, vector<1x1x256xf32>
    %135 = vector.shape_cast %134 : vector<1x1x256xf32> to vector<1x256xf32>
    %136 = vector.shape_cast %130 : vector<1x256xf32> to vector<1x1x256xf32>
    tpu.vector_store %arg3[%c0_32, %c8, %c0_33], %136 {strides = array<i32>} : memref<1x16x256xf32, #tpu.memory_space<vmem>>, vector<1x1x256xf32>,
    %c0_34 = arith.constant 0 : index
    %c3 = arith.constant 3 : index
    %c0_35 = arith.constant 0 : index
    %137 = vector.load %arg3[%c0_34, %c3, %c0_35] : memref<1x16x256xf32, #tpu.memory_space<vmem>>, vector<1x1x256xf32>
    %138 = vector.shape_cast %137 : vector<1x1x256xf32> to vector<1x256xf32>
    %139 = vector.shape_cast %21 : vector<1x256xf32> to vector<1x1x256xf32>
    tpu.vector_store %arg3[%c0_34, %c3, %c0_35], %139 {strides = array<i32>} : memref<1x16x256xf32, #tpu.memory_space<vmem>>, vector<1x1x256xf32>,
    %140 = arith.mulf %43, %43 : vector<4x256xf32>
    %141 = arith.mulf %45, %45 : vector<4x256xf32>
    %142 = arith.addf %140, %141 : vector<4x256xf32>
    %143 = arith.mulf %47, %47 : vector<4x256xf32>
    %144 = arith.addf %142, %143 : vector<4x256xf32>
    %cst_36 = arith.constant dense<0.000000e+00> : vector<256xf32>
    %145 = vector.multi_reduction <add>, %140, %cst_36 [0] : vector<4x256xf32> to vector<256xf32>
    %146 = vector.shape_cast %145 : vector<256xf32> to vector<1x256xf32>
    %cst_37 = arith.constant 2.500000e-01 : f32
    %147 = vector.broadcast %cst_37 : f32 to vector<1x256xf32>
    %148 = arith.mulf %146, %147 : vector<1x256xf32>
    %cst_38 = arith.constant dense<0.000000e+00> : vector<256xf32>
    %149 = vector.multi_reduction <add>, %144, %cst_38 [0] : vector<4x256xf32> to vector<256xf32>
    %150 = vector.shape_cast %149 : vector<256xf32> to vector<1x256xf32>
    %cst_39 = arith.constant 0.0833333358 : f32
    %151 = vector.broadcast %cst_39 : f32 to vector<1x256xf32>
    %152 = arith.mulf %150, %151 : vector<1x256xf32>
    %153 = arith.mulf %0, %148 : vector<1x256xf32>
    %154 = arith.mulf %2, %152 : vector<1x256xf32>
    %155 = arith.addf %153, %154 : vector<1x256xf32>
    %156 = arith.mulf %41, %41 : vector<1x256xf32>
    %157 = arith.addf %155, %156 : vector<1x256xf32>
    %c0_40 = arith.constant 0 : index
    %c5 = arith.constant 5 : index
    %c0_41 = arith.constant 0 : index
    %158 = vector.load %arg3[%c0_40, %c5, %c0_41] : memref<1x16x256xf32, #tpu.memory_space<vmem>>, vector<1x1x256xf32>
    %159 = vector.shape_cast %158 : vector<1x1x256xf32> to vector<1x256xf32>
    %160 = vector.shape_cast %157 : vector<1x256xf32> to vector<1x1x256xf32>
    tpu.vector_store %arg3[%c0_40, %c5, %c0_41], %160 {strides = array<i32>} : memref<1x16x256xf32, #tpu.memory_space<vmem>>, vector<1x1x256xf32>,
    %161 = arith.mulf %43, %63 : vector<4x256xf32>
    %162 = arith.mulf %45, %65 : vector<4x256xf32>
    %163 = arith.addf %161, %162 : vector<4x256xf32>
    %164 = arith.mulf %47, %67 : vector<4x256xf32>
    %165 = arith.addf %163, %164 : vector<4x256xf32>
    %cst_42 = arith.constant dense<0.000000e+00> : vector<256xf32>
    %166 = vector.multi_reduction <add>, %161, %cst_42 [0] : vector<4x256xf32> to vector<256xf32>
    %167 = vector.shape_cast %166 : vector<256xf32> to vector<1x256xf32>
    %cst_43 = arith.constant 2.500000e-01 : f32
    %168 = vector.broadcast %cst_43 : f32 to vector<1x256xf32>
    %169 = arith.mulf %167, %168 : vector<1x256xf32>
    %cst_44 = arith.constant dense<0.000000e+00> : vector<256xf32>
    %170 = vector.multi_reduction <add>, %165, %cst_44 [0] : vector<4x256xf32> to vector<256xf32>
    %171 = vector.shape_cast %170 : vector<256xf32> to vector<1x256xf32>
    %cst_45 = arith.constant 0.0833333358 : f32
    %172 = vector.broadcast %cst_45 : f32 to vector<1x256xf32>
    %173 = arith.mulf %171, %172 : vector<1x256xf32>
    %174 = arith.mulf %0, %169 : vector<1x256xf32>
    %175 = arith.mulf %2, %173 : vector<1x256xf32>
    %176 = arith.addf %174, %175 : vector<1x256xf32>
    %177 = arith.mulf %41, %61 : vector<1x256xf32>
    %178 = arith.addf %176, %177 : vector<1x256xf32>
    %c0_46 = arith.constant 0 : index
    %c6 = arith.constant 6 : index
    %c0_47 = arith.constant 0 : index
    %179 = vector.load %arg3[%c0_46, %c6, %c0_47] : memref<1x16x256xf32, #tpu.memory_space<vmem>>, vector<1x1x256xf32>
    %180 = vector.shape_cast %179 : vector<1x1x256xf32> to vector<1x256xf32>
    %181 = vector.shape_cast %178 : vector<1x256xf32> to vector<1x1x256xf32>
    tpu.vector_store %arg3[%c0_46, %c6, %c0_47], %181 {strides = array<i32>} : memref<1x16x256xf32, #tpu.memory_space<vmem>>, vector<1x1x256xf32>,
    %c0_48 = arith.constant 0 : index
    %c9 = arith.constant 9 : index
    %c0_49 = arith.constant 0 : index
    %182 = vector.load %arg3[%c0_48, %c9, %c0_49] : memref<1x16x256xf32, #tpu.memory_space<vmem>>, vector<1x1x256xf32>
    %183 = vector.shape_cast %182 : vector<1x1x256xf32> to vector<1x256xf32>
    %184 = vector.shape_cast %178 : vector<1x256xf32> to vector<1x1x256xf32>
    tpu.vector_store %arg3[%c0_48, %c9, %c0_49], %184 {strides = array<i32>} : memref<1x16x256xf32, #tpu.memory_space<vmem>>, vector<1x1x256xf32>,
    %c0_50 = arith.constant 0 : index
    %c7 = arith.constant 7 : index
    %c0_51 = arith.constant 0 : index
    %185 = vector.load %arg3[%c0_50, %c7, %c0_51] : memref<1x16x256xf32, #tpu.memory_space<vmem>>, vector<1x1x256xf32>
    %186 = vector.shape_cast %185 : vector<1x1x256xf32> to vector<1x256xf32>
    %187 = vector.shape_cast %41 : vector<1x256xf32> to vector<1x1x256xf32>
    tpu.vector_store %arg3[%c0_50, %c7, %c0_51], %187 {strides = array<i32>} : memref<1x16x256xf32, #tpu.memory_space<vmem>>, vector<1x1x256xf32>,
    %188 = arith.mulf %63, %63 : vector<4x256xf32>
    %189 = arith.mulf %65, %65 : vector<4x256xf32>
    %190 = arith.addf %188, %189 : vector<4x256xf32>
    %191 = arith.mulf %67, %67 : vector<4x256xf32>
    %192 = arith.addf %190, %191 : vector<4x256xf32>
    %cst_52 = arith.constant dense<0.000000e+00> : vector<256xf32>
    %193 = vector.multi_reduction <add>, %188, %cst_52 [0] : vector<4x256xf32> to vector<256xf32>
    %194 = vector.shape_cast %193 : vector<256xf32> to vector<1x256xf32>
    %cst_53 = arith.constant 2.500000e-01 : f32
    %195 = vector.broadcast %cst_53 : f32 to vector<1x256xf32>
    %196 = arith.mulf %194, %195 : vector<1x256xf32>
    %cst_54 = arith.constant dense<0.000000e+00> : vector<256xf32>
    %197 = vector.multi_reduction <add>, %192, %cst_54 [0] : vector<4x256xf32> to vector<256xf32>
    %198 = vector.shape_cast %197 : vector<256xf32> to vector<1x256xf32>
    %cst_55 = arith.constant 0.0833333358 : f32
    %199 = vector.broadcast %cst_55 : f32 to vector<1x256xf32>
    %200 = arith.mulf %198, %199 : vector<1x256xf32>
    %201 = arith.mulf %0, %196 : vector<1x256xf32>
    %202 = arith.mulf %2, %200 : vector<1x256xf32>
    %203 = arith.addf %201, %202 : vector<1x256xf32>
    %204 = arith.mulf %61, %61 : vector<1x256xf32>
    %205 = arith.addf %203, %204 : vector<1x256xf32>
    %c0_56 = arith.constant 0 : index
    %c10 = arith.constant 10 : index
    %c0_57 = arith.constant 0 : index
    %206 = vector.load %arg3[%c0_56, %c10, %c0_57] : memref<1x16x256xf32, #tpu.memory_space<vmem>>, vector<1x1x256xf32>
    %207 = vector.shape_cast %206 : vector<1x1x256xf32> to vector<1x256xf32>
    %208 = vector.shape_cast %205 : vector<1x256xf32> to vector<1x1x256xf32>
    tpu.vector_store %arg3[%c0_56, %c10, %c0_57], %208 {strides = array<i32>} : memref<1x16x256xf32, #tpu.memory_space<vmem>>, vector<1x1x256xf32>,
    %c0_58 = arith.constant 0 : index
    %c11 = arith.constant 11 : index
    %c0_59 = arith.constant 0 : index
    %209 = vector.load %arg3[%c0_58, %c11, %c0_59] : memref<1x16x256xf32, #tpu.memory_space<vmem>>, vector<1x1x256xf32>
    %210 = vector.shape_cast %209 : vector<1x1x256xf32> to vector<1x256xf32>
    %211 = vector.shape_cast %61 : vector<1x256xf32> to vector<1x1x256xf32>
    tpu.vector_store %arg3[%c0_58, %c11, %c0_59], %211 {strides = array<i32>} : memref<1x16x256xf32, #tpu.memory_space<vmem>>, vector<1x1x256xf32>,
    %c0_60 = arith.constant 0 : index
    %c12 = arith.constant 12 : index
    %c0_61 = arith.constant 0 : index
    %212 = vector.load %arg3[%c0_60, %c12, %c0_61] : memref<1x16x256xf32, #tpu.memory_space<vmem>>, vector<1x1x256xf32>
    %213 = vector.shape_cast %212 : vector<1x1x256xf32> to vector<1x256xf32>
    %214 = vector.shape_cast %21 : vector<1x256xf32> to vector<1x1x256xf32>
    tpu.vector_store %arg3[%c0_60, %c12, %c0_61], %214 {strides = array<i32>} : memref<1x16x256xf32, #tpu.memory_space<vmem>>, vector<1x1x256xf32>,
    %c0_62 = arith.constant 0 : index
    %c13 = arith.constant 13 : index
    %c0_63 = arith.constant 0 : index
    %215 = vector.load %arg3[%c0_62, %c13, %c0_63] : memref<1x16x256xf32, #tpu.memory_space<vmem>>, vector<1x1x256xf32>
    %216 = vector.shape_cast %215 : vector<1x1x256xf32> to vector<1x256xf32>
    %217 = vector.shape_cast %41 : vector<1x256xf32> to vector<1x1x256xf32>
    tpu.vector_store %arg3[%c0_62, %c13, %c0_63], %217 {strides = array<i32>} : memref<1x16x256xf32, #tpu.memory_space<vmem>>, vector<1x1x256xf32>,
    %c0_64 = arith.constant 0 : index
    %c14 = arith.constant 14 : index
    %c0_65 = arith.constant 0 : index
    %218 = vector.load %arg3[%c0_64, %c14, %c0_65] : memref<1x16x256xf32, #tpu.memory_space<vmem>>, vector<1x1x256xf32>
    %219 = vector.shape_cast %218 : vector<1x1x256xf32> to vector<1x256xf32>
    %220 = vector.shape_cast %61 : vector<1x256xf32> to vector<1x1x256xf32>
    tpu.vector_store %arg3[%c0_64, %c14, %c0_65], %220 {strides = array<i32>} : memref<1x16x256xf32, #tpu.memory_space<vmem>>, vector<1x1x256xf32>,
    %c0_66 = arith.constant 0 : index
    %c15 = arith.constant 15 : index
    %c0_67 = arith.constant 0 : index
    %221 = vector.load %arg3[%c0_66, %c15, %c0_67] : memref<1x16x256xf32, #tpu.memory_space<vmem>>, vector<1x1x256xf32>
    %222 = vector.shape_cast %221 : vector<1x1x256xf32> to vector<1x256xf32>
    %223 = vector.shape_cast %3 : vector<1x256xf32> to vector<1x1x256xf32>
    tpu.vector_store %arg3[%c0_66, %c15, %c0_67], %223 {strides = array<i32>} : memref<1x16x256xf32, #tpu.memory_space<vmem>>, vector<1x1x256xf32>,
    return
  }
  func.func @transform_0(%arg0: i32) -> (i32, i32, i32) {
    %c0_i32 = arith.constant 0 : i32
    %c0_i32_0 = arith.constant 0 : i32
    %c0_i32_1 = arith.constant 0 : i32
    return %arg0, %c0_i32, %c0_i32_0 : i32, i32, i32
  }
  func.func @transform_1(%arg0: i32) -> (i32, i32) {
    %c0_i32 = arith.constant 0 : i32
    %c0_i32_0 = arith.constant 0 : i32
    %c0_i32_1 = arith.constant 0 : i32
    return %c0_i32, %c0_i32_0 : i32, i32
  }
  func.func @transform_2(%arg0: i32) -> (i32, i32, i32) {
    %c0_i32 = arith.constant 0 : i32
    %c0_i32_0 = arith.constant 0 : i32
    %c0_i32_1 = arith.constant 0 : i32
    return %arg0, %c0_i32, %c0_i32_0 : i32, i32, i32
  }
}

</mosaic_0001>

<bundles_post_ra>
// kernel: gauss_agg1_st.1
= control target key start
LH: loop header
LB: loop body
LE: loop exit
PB: predicated region body
PF: predicated region fallthrough
CT: control target
= control target key end

     0   :  { %s1174_s9 = smov 0   ;;  %s1649_s0 = inlined_call_operand.vmem [shape: f32[2,12,256], index: 0, kind: input, shape index: {}]   ;;  %s1650_s1 = inlined_call_operand.vmem [shape: f32[1,256], index: 1, kind: input, shape index: {}]   ;;  %s1651_s2 = inlined_call_operand.vmem [shape: f32[2,16,256], index: 2, kind: output, shape index: {}]  }
   0x1 LB: > { %s1107_s10 = sadd.s32 4294967295, %s1153_s9   ;;  %p1111_p0 = scmp.ge.s32.totalorder %s1153_s9, 1  ;;  %s1153_s9 = sphi %s1174_s9, %s12_s9  }
   0x2   : > { %p112_p1 = scmp.lt.s32.totalorder %s1153_s9, 3 }
   0x4   : > { %p113_p2 = pnand %p1111_p0, %p112_p1 }
   0x6   : > { %116 = sbr.rel (%p113_p2) target bundleno = 212 (0xd4), region = 28 }
   0xd   : > { %p134_p3 = scmp.lt.s32.totalorder %s1107_s10, 1  ;;  %v1652_v0 = vlaneseq  ;;  %v1155_v1 = vmov 1966171168   ;;  %v1156_v9 = vmov 1.0   ;;  %s1157_s18 = smov 1   ;;  %vm282_vm1 = vcmask 1043456  }
   0xe   : > { %v319_v2 = vunpack.c.l.s4 %v1155_v1  ;;  %s1158_s19 = smov 127  }
   0xf   : > { %s1682_s10 = smov (!%p134_p3, %s1107_s10), 1  ;;  %vm1191_vm0 = vcmp.lt.s32.totalorder %v1652_v0, 256  ;;  %v1200_v7 = vshrl.u32 %v1652_v0, 7 }
  0x10   : > { %s1133_s11 = sshll.u32 %s1682_s10, 5  ;;  %v320_v8 = vunpack.c.0.s8 %v319_v2 }
  0x11   : > { %s138_s14 = scalar_lea.vmem %s1649_s0, %s1133_s11  ;;  %s1188_s17 = scalar_lea.vmem %s1651_s2, %s1133_s11  ;;  %v206_v36 = vsub.s32 0, %v1200_v7  ;;  %v220_v56 = vsub.s32 4, %v1200_v7 }
  0x12   : > { %v148_v4 = vld [vmem:[%s138_s14 + $0x10] sm:$0xf]  ;;  %v1195_v5 = vld [vmem:[%s138_s14] sm:$0xff]  ;;  %v1197_v6 = vld [vmem:[%s138_s14 + $0x18] sm:$0xf]  ;;  %v1229_v44 = vsub.s32 %v320_v8, %v1200_v7 }
  0x13   : > { %1130 = vst.msk [vmem:[%s1188_s17 + $0x17] ss:$8 sm:$0x3] %vm1191_vm0, %v1156_v9  ;;  %152 = vrot.lane.b32.xlu0 %v148_v4, %s1157_s18  ;;  %v234_v10 = vrot.slane %v148_v4, 3  ;;  %v242_v11 = vrot.slane %v148_v4, 1  ;;  %150 = vrot.lane.b32.xlu1 %v1195_v5, %s1157_s18  ;;  %v180_v12 = vrot.slane %v1195_v5, 3 }
  0x14   : > { %v188_v13 = vrot.slane %v1195_v5, 1  ;;  %v1208_v14 = vld [vmem:[%s138_s14 + $0x8] sm:$0xff]  ;;  %v235_v15 = vrot.slane %v1197_v6, 3  ;;  %v243_v16 = vrot.slane %v1197_v6, 1 }
  0x15   : > { %v181_v17 = vrot.slane %v1208_v14, 3  ;;  %v189_v18 = vrot.slane %v1208_v14, 1  ;;  %v184_v19 = vadd.f32 %v180_v12, %v1195_v5  ;;  %v238_v21 = vadd.f32 %v234_v10, %v148_v4 }
  0x16   : > { %v192_v20 = vadd.f32 %v188_v13, %v1195_v5  ;;  %v246_v22 = vadd.f32 %v242_v11, %v148_v4  ;;  %v239_v25 = vadd.f32 %v235_v15, %v1197_v6  ;;  %v247_v26 = vadd.f32 %v243_v16, %v1197_v6 }
  0x17   : > { %v185_v23 = vadd.f32 %v181_v17, %v1208_v14  ;;  %v193_v24 = vadd.f32 %v189_v18, %v1208_v14  ;;  %v186_v27 = vmul.f32 2.0, %v184_v19  ;;  %156 = vrot.lane.b32.xlu0 %v1197_v6, %s1157_s18  ;;  %154 = vrot.lane.b32.xlu1 %v1208_v14, %s1157_s18  ;;  %v240_v29 = vmul.f32 2.0, %v238_v21 }
  0x18   : > { %v196_v28 = vrot.slane %v192_v20, 1  ;;  %v250_v30 = vrot.slane %v246_v22, 1  ;;  %v241_v33 = vmul.f32 2.0, %v239_v25  ;;  %v251_v34 = vrot.slane %v247_v26, 1 }
  0x19   : > { %v187_v31 = vmul.f32 2.0, %v185_v23  ;;  %v197_v32 = vrot.slane %v193_v24, 1 }
  0x1a   : > { %v200_v35 = vadd.f32 %v196_v28, %v186_v27  ;;  %v254_v37 = vadd.f32 %v250_v30, %v240_v29  ;;  %v255_v39 = vadd.f32 %v251_v34, %v241_v33 }
  0x1b   : > { %v201_v38 = vadd.f32 %v197_v32, %v187_v31  ;;  %167 = vrot.lane.b32.xlu0 %v148_v4, %s1158_s19  ;;  %171 = vrot.lane.b32.xlu1 %v1197_v6, %s1158_s19 }
  0x1c   : > { %v1223_v40 = vmul.f32 0.16666667, %v200_v35  ;;  %v256_v41 = vmul.f32 0.16666667, %v254_v37  ;;  %v257_v43 = vmul.f32 0.16666667, %v255_v39 }
  0x1d   : > { %v1226_v42 = vmul.f32 0.16666667, %v201_v38 }
  0x1e   : > { %v1231_v45 = vrot.slane %v256_v41, %v206_v36  ;;  %v1234_v46 = vmul.f32 %v256_v41, %v1223_v40  ;;  %v866_v47 = vrot.slane %v256_v41, 4  ;;  %v1236_v48 = vmul.f32 %v256_v41, %v256_v41 }
  0x1f   : > { %v621_v49 = vcombine.low %v1223_v40, %v1226_v42  ;;  %v897_v50 = vcombine.high %v1223_v40, %v1226_v42  ;;  %v1242_v51 = vrot.slane %v257_v43, %v206_v36  ;;  %v867_v52 = vrot.slane %v257_v43, 4  ;;  %165 = vrot.lane.b32.xlu0 %v1195_v5, %s1158_s19  ;;  %169 = vrot.lane.b32.xlu1 %v1208_v14, %s1158_s19 }
  0x20   : > { %v1246_v53 = vmul.f32 %v257_v43, %v257_v43  ;;  %v1249_v54 = vsub.f32 %v148_v4, %v1231_v45  ;;  %v1252_v55 = vmul.f32 %v257_v43, %v1226_v42  ;;  %v1259_v59 = vmul.f32 %v866_v47, %v1223_v40 }
  0x21   : > { %v267_v57 = vsub.f32 %v1197_v6, %v1242_v51  ;;  %v628_v58 = vrot.slane %v621_v49, %v1229_v44  ;;  %v1262_v60 = vmul.f32 %v867_v52, %v1226_v42  ;;  %v904_v62 = vrot.slane %v897_v50, %v1229_v44 }
  0x22   : > { %1660 = vst [vmem:[#allocation2_spill] sm:$0xff] %v1259_v59  ;;  %v1269_v63 = vmul.f32 %v1249_v54, %v1249_v54  ;;  %v1021_v6 = vcombine.low %v256_v41, %v257_v43  ;;  %v1277_v7 = vrot.slane %v1226_v42, %v206_v36  ;;  %v1283_v10 = vrot.slane %v1226_v42, %v220_v56 }
  0x23   : > { %1661 = vst [vmem:[#allocation3_spill] sm:$0xff] %v1262_v60  ;;  %v1273_v2 = vmul.f32 %v267_v57, %v267_v57  ;;  %v635_v4 = vrot.slane %v628_v58, %v1229_v44  ;;  %v911_v8 = vrot.slane %v904_v62, %v1229_v44  ;;  %v756_v18 = vrot.slane %v267_v57, 4 }
  0x24   : > { %v926_v9 = vsel %vm282_vm1, %v1269_v63, 0.0  ;;  %v1028_v13 = vrot.slane %v1021_v6, %v1229_v44  ;;  %v213_v15 = vsub.f32 %v1208_v14, %v1277_v7  ;;  %v227_v17 = vsub.f32 %v1208_v14, %v1283_v10 }
  0x25   : > { %v933_v11 = vsel %vm282_vm1, %v1273_v2, 0.0  ;;  %1120 = vst.msk [vmem:[%s1188_s17 + $0x3] ss:$8 sm:$0x3] %vm1191_vm0, %v635_v4  ;;  %v927_v12 = vrot.slane %v926_v9, 4  ;;  %v1305_v19 = vrot.slane %v1223_v40, %v206_v36  ;;  %v1333_v38 = vrot.slane %v1223_v40, %v220_v56 }
  0x26   : > { %1127 = vst.msk [vmem:[%s1188_s17 + $0x14] ss:$8 sm:$0x3] %vm1191_vm0, %v635_v4  ;;  %v934_v16 = vrot.slane %v933_v11, 4  ;;  %v1035_v21 = vrot.slane %v1028_v13, %v1229_v44  ;;  %v1308_v22 = vmul.f32 %v213_v15, %v213_v15  ;;  %v1310_v23 = vmul.f32 %v267_v57, %v213_v15 }
  0x27   : > { %1124 = vst.msk [vmem:[%s1188_s17 + $0x7] ss:$8 sm:$0x3] %vm1191_vm0, %v911_v8  ;;  %1128 = vst.msk [vmem:[%s1188_s17 + $0x15] ss:$8 sm:$0x3] %vm1191_vm0, %v911_v8  ;;  %v928_v20 = vadd.f32 %v927_v12, %v926_v9  ;;  %v1312_v26 = vmul.f32 %v227_v17, %v227_v17  ;;  %v1314_v27 = vmul.f32 %v756_v18, %v227_v17 }
  0x28   : > { %v935_v24 = vadd.f32 %v934_v16, %v933_v11  ;;  %v384_v25 = vrot.slane %v227_v17, 4  ;;  %1126 = vst.msk [vmem:[%s1188_s17 + $0x13] ss:$8 sm:$0x3] %vm1191_vm0, %v1035_v21  ;;  %v290_v14 = vsel %vm282_vm1, %v1308_v22, 0.0  ;;  %v530_v29 = vsel %vm282_vm1, %v1310_v23, 0.0 }
  0x29   : > { %v929_v28 = vrot.slane %v928_v20, 2  ;;  %1129 = vst.msk [vmem:[%s1188_s17 + $0x16] ss:$8 sm:$0x3] %vm1191_vm0, %v1035_v21  ;;  %v212_v30 = vsub.f32 %v1195_v5, %v1305_v19  ;;  %v291_v32 = vrot.slane %v290_v14, 4  ;;  %v531_v34 = vrot.slane %v530_v29, 4 }
  0x2a   : > { %v936_v31 = vrot.slane %v935_v24, 2  ;;  %v1328_v33 = vmul.f32 %v384_v25, %v213_v15  ;;  %v653_v36 = vrot.slane %v1312_v26, 4  ;;  %v784_v37 = vrot.slane %v1314_v27, 4 }
  0x2b   : > { %v930_v35 = vadd.f32 %v929_v28, %v928_v20  ;;  %v292_v41 = vadd.f32 %v291_v32, %v290_v14  ;;  %v532_v47 = vadd.f32 %v531_v34, %v530_v29  ;;  %v226_v11 = vsub.f32 %v1195_v5, %v1333_v38 }
  0x2c   : > { %v937_v39 = vadd.f32 %v936_v31, %v935_v24  ;;  %v416_v43 = vsel %vm282_vm1, %v1328_v33, 0.0  ;;  %v663_v52 = vsel %vm282_vm1, %v653_v36, 0.0  ;;  %v794_v57 = vsel %vm282_vm1, %v784_v37, 0.0 }
  0x2d   : > { %v931_v49 = vrot.slane %v930_v35, 1  ;;  %v417_v50 = vrot.slane %v416_v43, 4  ;;  %v293_v62 = vrot.slane %v292_v41, 2  ;;  %v533_v4 = vrot.slane %v532_v47, 2 }
  0x2e   : > { %v938_v58 = vrot.slane %v937_v39, 1  ;;  %v664_v6 = vrot.slane %v663_v52, 4  ;;  %v795_v56 = vrot.slane %v794_v57, 4  ;;  %v1343_v18 = vmul.f32 %v212_v30, %v212_v30 }
  0x2f   : > { %v932_v8 = vadd.f32 %v931_v49, %v930_v35  ;;  %v418_v9 = vadd.f32 %v417_v50, %v416_v43  ;;  %v294_v13 = vadd.f32 %v293_v62, %v292_v41  ;;  %v534_v17 = vadd.f32 %v533_v4, %v532_v47 }
  0x30   : > { %v939_v12 = vadd.f32 %v938_v58, %v937_v39  ;;  %v665_v15 = vadd.f32 %v664_v6, %v663_v52  ;;  %v796_v24 = vadd.f32 %v795_v56, %v794_v57  ;;  %v283_v28 = vsel %vm282_vm1, %v1343_v18, 0.0 }
  0x31   : > { %v1341_v16 = vmul.f32 0.25, %v932_v8  ;;  %v419_v21 = vrot.slane %v418_v9, 2  ;;  %v295_v25 = vrot.slane %v294_v13, 1  ;;  %v383_v14 = vrot.slane %v226_v11, 4 }
  0x32   : > { %v1345_v20 = vmul.f32 0.25, %v939_v12  ;;  %v666_v29 = vrot.slane %v665_v15, 2  ;;  %v535_v31 = vrot.slane %v534_v17, 1  ;;  %v284_v32 = vrot.slane %v283_v28, 4 }
  0x33   : > { %v1351_v34 = vmul.f32 %v383_v14, %v212_v30  ;;  %v420_v35 = vadd.f32 %v419_v21, %v418_v9  ;;  %v797_v36 = vrot.slane %v796_v24, 2  ;;  %v296_v37 = vadd.f32 %v295_v25, %v294_v13 }
  0x34   : > { %v960_v5 = vcombine.low %v1341_v16, %v1345_v20  ;;  %v285_v39 = vadd.f32 %v284_v32, %v283_v28  ;;  %v667_v43 = vadd.f32 %v666_v29, %v665_v15  ;;  %v755_v47 = vrot.slane %v1249_v54, 4 }
  0x35   : > { %v409_v41 = vsel %vm282_vm1, %v1351_v34, 0.0  ;;  %v1357_v50 = vmul.f32 %v1249_v54, %v212_v30  ;;  %v536_v52 = vadd.f32 %v535_v31, %v534_v17  ;;  %v1359_v58 = vmul.f32 %v226_v11, %v226_v11 }
  0x36   : > { %v410_v49 = vrot.slane %v409_v41, 4  ;;  %v286_v57 = vrot.slane %v285_v39, 2  ;;  %v421_v62 = vrot.slane %v420_v35, 1  ;;  %v798_v4 = vadd.f32 %v797_v36, %v796_v24 }
  0x37   : > { %v523_v8 = vsel %vm282_vm1, %v1357_v50, 0.0  ;;  %v1363_v9 = vmul.f32 0.25, %v296_v37  ;;  %v652_v13 = vrot.slane %v1359_v58, 4  ;;  %v668_v15 = vrot.slane %v667_v43, 1 }
  0x38   : > { %v411_v6 = vadd.f32 %v410_v49, %v409_v41  ;;  %v287_v56 = vadd.f32 %v286_v57, %v285_v39  ;;  %v524_v12 = vrot.slane %v523_v8, 4  ;;  %v1366_v54 = vmul.f32 %v755_v47, %v226_v11 }
  0x39   : > { %v1370_v30 = vmul.f32 %v1226_v42, %v1226_v42  ;;  %v656_v25 = vsel %vm282_vm1, %v652_v13, 0.0  ;;  %v483_v28 = vrot.slane %v1226_v42, 4  ;;  %v422_v14 = vadd.f32 %v421_v62, %v420_v35 }
  0x3a   : > { %v412_v21 = vrot.slane %v411_v6, 2  ;;  %v288_v17 = vrot.slane %v287_v56, 1  ;;  %v525_v24 = vadd.f32 %v524_v12, %v523_v8  ;;  %v657_v31 = vrot.slane %v656_v25, 4 }
  0x3b   : > { %1662 = vst [vmem:[#allocation4_spill] sm:$0xff] %v1370_v30  ;;  %v783_v32 = vrot.slane %v1366_v54, 4  ;;  %v1376_v11 = vmul.f32 %v483_v28, %v1226_v42  ;;  %v1380_v39 = vmul.f32 %v1223_v40, %v1223_v40  ;;  %v482_v57 = vrot.slane %v1223_v40, 4 }
  0x3c   : > { %v413_v29 = vadd.f32 %v412_v21, %v411_v6  ;;  %v289_v36 = vadd.f32 %v288_v17, %v287_v56  ;;  %v526_v37 = vrot.slane %v525_v24, 2  ;;  %v658_v47 = vadd.f32 %v657_v31, %v656_v25 }
  0x3d   : > { %1663 = vst [vmem:[#allocation5_spill] sm:$0xff] %v1380_v39  ;;  %v787_v49 = vsel %vm282_vm1, %v783_v32, 0.0  ;;  %v358_v8 = vcombine.low %v1380_v39, %v1370_v30  ;;  %v424_v56 = vmul.f32 0.25, %v422_v14  ;;  %v1387_v13 = vmul.f32 %v482_v57, %v1223_v40 }
  0x3e   : > { %v414_v41 = vrot.slane %v413_v29, 1  ;;  %v297_v35 = vmul.f32 0.25, %v289_v36  ;;  %v527_v62 = vadd.f32 %v526_v37, %v525_v24  ;;  %v788_v6 = vrot.slane %v787_v49, 4 }
  0x3f   : > { %v659_v42 = vrot.slane %v658_v47, 2  ;;  %v799_v21 = vrot.slane %v798_v4, 1  ;;  %v669_v31 = vadd.f32 %v668_v15, %v667_v43  ;;  %v538_v36 = vmul.f32 0.25, %v536_v52 }
  0x40   : > { %v415_v12 = vadd.f32 %v414_v41, %v413_v29  ;;  %v317_v17 = vcombine.low %v297_v35, %v1363_v9  ;;  %v528_v25 = vrot.slane %v527_v62, 1  ;;  %v789_v28 = vadd.f32 %v788_v6, %v787_v49 }
  0x41   : > { %v660_v61 = vadd.f32 %v659_v42, %v658_v47  ;;  %v800_v41 = vadd.f32 %v799_v21, %v798_v4  ;;  %v1394_v9 = vmul.f32 0.25, %v669_v31  ;;  %v1665_v4 = vlaneseq }
  0x42   : > { %v423_v32 = vmul.f32 0.25, %v415_v12  ;;  %v529_v37 = vadd.f32 %v528_v25, %v527_v62  ;;  %v790_v1 = vrot.slane %v789_v28, 2  ;;  %v1419_v25 = vld [vmem:[%s1650_s1] sm:$0x3]  ;;  %v1666_v16 = vcombine.low %v1236_v48, %v1246_v53 }
  0x43   : > { %v661_v29 = vrot.slane %v660_v61, 1  ;;  %v1398_v35 = vmul.f32 0.25, %v800_v41  ;;  %v1413_v12 = vand.u32 127, %v1665_v4  ;;  %v1667_v31 = vcombine.low %v1234_v46, %v1252_v55 }
  0x44   : > { %v443_v14 = vcombine.low %v423_v32, %v424_v56  ;;  %v537_v57 = vmul.f32 0.25, %v529_v37  ;;  %v791_v0 = vadd.f32 %v790_v1, %v789_v28  ;;  %v1422_v28 = vrot.slane %v317_v17, %v1229_v44 }
  0x45   : > { %v662_v49 = vadd.f32 %v661_v29, %v660_v61  ;;  %1664 = vst [vmem:[#allocation6_spill] sm:$0xff] %v1398_v35  ;;  %v967_v61 = vrot.slane %v960_v5, %v1229_v44  ;;  %v1428_v20 = vrot.slane %v1666_v16, %v1229_v44  ;;  %v1431_v5 = vrot.slane %v358_v8, %v1229_v44 }
  0x46   : > { %v557_v43 = vcombine.low %v537_v57, %v538_v36  ;;  %v792_v15 = vrot.slane %v791_v0, 1  ;;  %v1437_v32 = vrot.slane %v1667_v31, %v1229_v44  ;;  %vm160_vm2 = vcmp.lt.s32.totalorder %v1413_v12, 1 }
  0x47   : > { %v1396_v47 = vmul.f32 0.25, %v662_v49  ;;  %v1444_v36 = vrot.slane %v443_v14, %v1229_v44  ;;  %v1450_v53 = vsub.f32 1.0, %v1419_v25  ;;  %vm173_vm3 = vcmp.lt.s32.totalorder %v1413_v12, 127 }
  0x48   : > { %v793_v52 = vadd.f32 %v792_v15, %v791_v0  ;;  %v974_v0 = vrot.slane %v967_v61, %v1229_v44  ;;  %v1447_v48 = vrot.slane %v557_v43, %v1229_v44  ;;  %v331_v55 = vrot.slane %v1422_v28, %v1229_v44 }
  0x49   : > { %v457_v16 = vrot.slane %v1444_v36, %v1229_v44 }
  0x4a   : > { %v1404_v56 = vmul.f32 0.25, %v793_v52  ;;  %v1441_v17 = vmul.f32 %v974_v0, %v1419_v25 }
  0x85   : > { %v153_v42 = vpop.permute.xlu0 %152  ;;  %v151_v21 = vpop.permute.xlu1 %150 }
  0x89   : > { %v157_v8 = vpop.permute.xlu0 %156  ;;  %v155_v46 = vpop.permute.xlu1 %154 }
  0x8a   : > { %v162_v41 = vsel %vm160_vm2, %v153_v42, %v157_v8  ;;  %v164_v57 = vsel %vm160_vm2, %v157_v8, %v153_v42  ;;  %v161_v49 = vsel %vm160_vm2, %v151_v21, %v155_v46  ;;  %v163_v43 = vsel %vm160_vm2, %v155_v46, %v151_v21 }
  0x8b   : > { %v268_v15 = vsub.f32 %v164_v57, %v1231_v45  ;;  %v269_v52 = vsub.f32 %v162_v41, %v1242_v51  ;;  %v214_v61 = vsub.f32 %v163_v43, %v1305_v19  ;;  %v215_v4 = vsub.f32 %v161_v49, %v1277_v7 }
  0x8c   : > { %v228_v0 = vsub.f32 %v163_v43, %v1333_v38  ;;  %v229_v28 = vsub.f32 %v161_v49, %v1283_v10  ;;  %v571_v42 = vrot.slane %v1447_v48, %v1229_v44 }
  0x8d   : > { %v763_v31 = vrot.slane %v268_v15, 4  ;;  %v764_v21 = vrot.slane %v269_v52, 4  ;;  %v918_v8 = vmul.f32 %v268_v15, %v268_v15  ;;  %v919_v46 = vmul.f32 %v269_v52, %v269_v52  ;;  %v168_v57 = vpop.permute.xlu0 %167  ;;  %v172_v41 = vpop.permute.xlu1 %171 }
  0x8e   : > { %v274_v62 = vmul.f32 %v214_v61, %v214_v61  ;;  %v275_v40 = vmul.f32 %v215_v4, %v215_v4  ;;  %v391_v1 = vrot.slane %v228_v0, 4  ;;  %v392_v6 = vrot.slane %v229_v28, 4 }
  0x8f   : > { %v920_v43 = vadd.f32 %v918_v8, %v1269_v63  ;;  %v921_v49 = vadd.f32 %v919_v46, %v1273_v2  ;;  %v515_v29 = vmul.f32 %v268_v15, %v214_v61  ;;  %v516_v14 = vmul.f32 %v269_v52, %v215_v4 }
  0x90   : > { %v276_v36 = vadd.f32 %v274_v62, %v1343_v18  ;;  %v277_v48 = vadd.f32 %v275_v40, %v1308_v22  ;;  %v395_v37 = vmul.f32 %v391_v1, %v214_v61  ;;  %v396_v24 = vmul.f32 %v392_v6, %v215_v4 }
  0x91   : > { %v517_v60 = vadd.f32 %v515_v29, %v1357_v50  ;;  %v518_v59 = vadd.f32 %v516_v14, %v1310_v23  ;;  %v642_v30 = vmul.f32 %v228_v0, %v228_v0  ;;  %v643_v39 = vmul.f32 %v229_v28, %v229_v28  ;;  %v166_v15 = vpop.permute.xlu0 %165  ;;  %v170_v52 = vpop.permute.xlu1 %169 }
  0x92   : > { %v397_v35 = vadd.f32 %v395_v37, %v1351_v34  ;;  %v398_v63 = vadd.f32 %v396_v24, %v1328_v33  ;;  %v767_v8 = vmul.f32 %v763_v31, %v228_v0  ;;  %v768_v2 = vmul.f32 %v764_v21, %v229_v28 }
  0x93   : > { %v1480_v18 = vadd.f32 %v642_v30, %v1359_v58  ;;  %v1483_v22 = vadd.f32 %v643_v39, %v1312_v26  ;;  %v175_v50 = vsel %vm173_vm3, %v168_v57, %v172_v41  ;;  %v177_v23 = vsel %vm173_vm3, %v172_v41, %v168_v57 }
  0x94   : > { %v1490_v34 = vadd.f32 %v767_v8, %v1366_v54  ;;  %v1493_v33 = vadd.f32 %v768_v2, %v1314_v27  ;;  %v1496_v24 = vsub.f32 %v175_v50, %v1231_v45  ;;  %v1499_v58 = vsub.f32 %v177_v23, %v1242_v51 }
  0x95   : > { %v1502_v26 = vmul.f32 %v331_v55, %v1419_v25  ;;  %v174_v30 = vsel %vm173_vm3, %v166_v15, %v170_v52  ;;  %v176_v39 = vsel %vm173_vm3, %v170_v52, %v166_v15  ;;  %v1668_v27 = vcombine.low %v1387_v13, %v1376_v11 }
  0x96   : > { %v1515_v45 = vmul.f32 %v457_v16, %v1419_v25  ;;  %v1518_v51 = vmul.f32 %v571_v42, %v1419_v25  ;;  %v922_v40 = vmul.f32 %v1496_v24, %v1496_v24  ;;  %v923_v62 = vmul.f32 %v1499_v58, %v1499_v58 }
  0x97   : > { %v1512_v54 = vrot.slane %v1668_v27, %v1229_v44  ;;  %v216_v6 = vsub.f32 %v174_v30, %v1305_v19  ;;  %v217_v1 = vsub.f32 %v176_v39, %v1277_v7  ;;  %v1527_v11 = vsub.f32 %v174_v30, %v1333_v38 }
  0x98   : > { %v1530_v13 = vsub.f32 %v176_v39, %v1283_v10  ;;  %v773_v12 = vrot.slane %v1496_v24, 4  ;;  %v774_v55 = vrot.slane %v1499_v58, 4  ;;  %v924_v37 = vadd.f32 %v922_v40, %v920_v43 }
  0x99   : > { %v925_v14 = vadd.f32 %v923_v62, %v921_v49  ;;  %v278_v29 = vmul.f32 %v216_v6, %v216_v6  ;;  %v279_v61 = vmul.f32 %v217_v1, %v217_v1  ;;  %v401_v4 = vrot.slane %v1527_v11, 4 }
  0x9a   : > { %v402_v19 = vrot.slane %v1530_v13, 4  ;;  %v942_v7 = vsel %vm282_vm1, %v924_v37, 0.0  ;;  %v519_v0 = vmul.f32 %v1496_v24, %v216_v6  ;;  %v520_v10 = vmul.f32 %v1499_v58, %v217_v1 }
  0x9b   : > { %v949_v38 = vsel %vm282_vm1, %v925_v14, 0.0  ;;  %v943_v28 = vrot.slane %v942_v7, 4  ;;  %v280_v42 = vadd.f32 %v278_v29, %v276_v36  ;;  %v281_v31 = vadd.f32 %v279_v61, %v277_v48 }
  0x9c   : > { %v950_v16 = vrot.slane %v949_v38, 4  ;;  %v405_v21 = vmul.f32 %v401_v4, %v216_v6  ;;  %v406_v46 = vmul.f32 %v402_v19, %v217_v1  ;;  %v521_v57 = vadd.f32 %v519_v0, %v517_v60 }
  0x9d   : > { %v522_v41 = vadd.f32 %v520_v10, %v518_v59  ;;  %v944_v43 = vadd.f32 %v943_v28, %v942_v7  ;;  %v299_v8 = vsel %vm282_vm1, %v280_v42, 0.0  ;;  %v306_v2 = vsel %vm282_vm1, %v281_v31, 0.0 }
  0x9e   : > { %v951_v49 = vadd.f32 %v950_v16, %v949_v38  ;;  %v300_v15 = vrot.slane %v299_v8, 4  ;;  %v307_v52 = vrot.slane %v306_v2, 4  ;;  %v407_v50 = vadd.f32 %v405_v21, %v397_v35 }
  0x9f   : > { %v408_v23 = vadd.f32 %v406_v46, %v398_v63  ;;  %v945_v30 = vrot.slane %v944_v43, 2  ;;  %v539_v27 = vsel %vm282_vm1, %v521_v57, 0.0  ;;  %v546_v36 = vsel %vm282_vm1, %v522_v41, 0.0 }
  0xa0   : > { %v952_v39 = vrot.slane %v951_v49, 2  ;;  %v301_v48 = vadd.f32 %v300_v15, %v299_v8  ;;  %v308_v40 = vadd.f32 %v307_v52, %v306_v2  ;;  %v425_v59 = vsel %vm282_vm1, %v407_v50, 0.0 }
  0xa1   : > { %v432_v60 = vsel %vm282_vm1, %v408_v23, 0.0  ;;  %v946_v62 = vadd.f32 %v945_v30, %v944_v43  ;;  %v426_v1 = vrot.slane %v425_v59, 4  ;;  %v540_v35 = vrot.slane %v539_v27, 4 }
  0xa2   : > { %v953_v6 = vadd.f32 %v952_v39, %v951_v49  ;;  %v433_v37 = vrot.slane %v432_v60, 4  ;;  %v302_v14 = vrot.slane %v301_v48, 2  ;;  %v309_v29 = vrot.slane %v308_v40, 2 }
  0xa3   : > { %v547_v63 = vrot.slane %v546_v36, 4  ;;  %v947_v61 = vrot.slane %v946_v62, 1  ;;  %v427_v19 = vadd.f32 %v426_v1, %v425_v59  ;;  %v541_v10 = vadd.f32 %v540_v35, %v539_v27 }
  0xa4   : > { %v954_v4 = vrot.slane %v953_v6, 1  ;;  %v434_v7 = vadd.f32 %v433_v37, %v432_v60  ;;  %v303_v38 = vadd.f32 %v302_v14, %v301_v48  ;;  %v310_v0 = vadd.f32 %v309_v29, %v308_v40 }
  0xa5   : > { %v548_v28 = vadd.f32 %v547_v63, %v546_v36  ;;  %v948_v16 = vadd.f32 %v947_v61, %v946_v62  ;;  %v428_v31 = vrot.slane %v427_v19, 2  ;;  %v542_v41 = vrot.slane %v541_v10, 2 }
  0xa6   : > { %v955_v42 = vadd.f32 %v954_v4, %v953_v6  ;;  %v435_v21 = vrot.slane %v434_v7, 2  ;;  %v304_v46 = vrot.slane %v303_v38, 1  ;;  %v311_v57 = vrot.slane %v310_v0, 1 }
  0xa7   : > { %v549_v43 = vrot.slane %v548_v28, 2  ;;  %v956_v49 = vmul.f32 0.083333336, %v948_v16  ;;  %v429_v2 = vadd.f32 %v428_v31, %v427_v19  ;;  %v543_v23 = vadd.f32 %v542_v41, %v541_v10 }
  0xa8   : > { %v957_v8 = vmul.f32 0.083333336, %v955_v42  ;;  %v436_v15 = vadd.f32 %v435_v21, %v434_v7  ;;  %v305_v52 = vadd.f32 %v304_v46, %v303_v38  ;;  %v312_v50 = vadd.f32 %v311_v57, %v310_v0 }
  0xa9   : > { %v550_v30 = vadd.f32 %v549_v43, %v548_v28  ;;  %v430_v48 = vrot.slane %v429_v2, 1  ;;  %v646_v36 = vmul.f32 %v1527_v11, %v1527_v11  ;;  %v544_v60 = vrot.slane %v543_v23, 1 }
  0xaa   : > { %v979_v39 = vcombine.low %v956_v49, %v957_v8  ;;  %v437_v27 = vrot.slane %v436_v15, 1  ;;  %v313_v40 = vmul.f32 0.083333336, %v305_v52  ;;  %v314_v59 = vmul.f32 0.083333336, %v312_v50 }
  0xab   : > { %v551_v62 = vrot.slane %v550_v30, 1  ;;  %v431_v1 = vadd.f32 %v430_v48, %v429_v2  ;;  %v647_v14 = vmul.f32 %v1530_v13, %v1530_v13  ;;  %v545_v35 = vadd.f32 %v544_v60, %v543_v23 }
  0xac   : > { %v986_v6 = vrot.slane %v979_v39, %v1229_v44  ;;  %v438_v37 = vadd.f32 %v437_v27, %v436_v15  ;;  %v336_v29 = vcombine.low %v313_v40, %v314_v59  ;;  %v648_v61 = vadd.f32 %v646_v36, %v1480_v18 }
  0xad   : > { %v552_v63 = vadd.f32 %v551_v62, %v550_v30  ;;  %v439_v19 = vmul.f32 0.083333336, %v431_v1  ;;  %v649_v38 = vadd.f32 %v647_v14, %v1483_v22  ;;  %v553_v10 = vmul.f32 0.083333336, %v545_v35 }
  0xae   : > { %v993_v4 = vrot.slane %v986_v6, %v1229_v44  ;;  %v440_v7 = vmul.f32 0.083333336, %v438_v37  ;;  %v343_v0 = vrot.slane %v336_v29, %v1229_v44  ;;  %v674_v16 = vrot.slane %v648_v61, 4 }
  0xaf   : > { %v554_v28 = vmul.f32 0.083333336, %v552_v63  ;;  %v675_v21 = vrot.slane %v649_v38, 4  ;;  %v777_v46 = vmul.f32 %v773_v12, %v1527_v11  ;;  %v778_v22 = vmul.f32 %v774_v55, %v1530_v13 }
  0xb0   : > { %v995_v42 = vmul.f32 %v993_v4, %v1450_v53  ;;  %v462_v31 = vcombine.low %v439_v19, %v440_v7  ;;  %v350_v18 = vrot.slane %v343_v0, %v1229_v44  ;;  %v678_v41 = vsel %vm282_vm1, %v674_v16, 0.0 }
  0xb1   : > { %v576_v57 = vcombine.low %v553_v10, %v554_v28  ;;  %v679_v8 = vrot.slane %v678_v41, 4  ;;  %v685_v2 = vsel %vm282_vm1, %v675_v21, 0.0  ;;  %v779_v15 = vadd.f32 %v777_v46, %v1490_v34 }
  0xb2   : > { %v996_v43 = vadd.f32 %v995_v42, %v1441_v17  ;;  %v469_v49 = vrot.slane %v462_v31, %v1229_v44  ;;  %v352_v24 = vmul.f32 %v350_v18, %v1450_v53  ;;  %v686_v12 = vrot.slane %v685_v2, 4 }
  0xb3   : > { %v583_v11 = vrot.slane %v576_v57, %v1229_v44  ;;  %v1669_v52 = vrot.slane %v1428_v20, %v1229_v44  ;;  %v680_v17 = vadd.f32 %v679_v8, %v678_v41  ;;  %v780_v55 = vadd.f32 %v778_v22, %v1493_v33 }
  0xb4   : > { %v476_v13 = vrot.slane %v469_v49, %v1229_v44  ;;  %v353_v50 = vadd.f32 %v352_v24, %v1502_v26  ;;  %v687_v30 = vadd.f32 %v686_v12, %v685_v2  ;;  %v805_v39 = vrot.slane %v779_v15, 4  ;;  %v1676_v49 = vld [vmem:[#allocation4_spill] sm:$0xff] }
  0xb5   : > { %v1017_v58 = vadd.f32 %v1669_v52, %v996_v43  ;;  %v590_v23 = vrot.slane %v583_v11, %v1229_v44  ;;  %v504_v20 = vrot.slane %v1512_v54, %v1229_v44  ;;  %v681_v48 = vrot.slane %v680_v17, 2  ;;  %v1675_v43 = vld [vmem:[#allocation5_spill] sm:$0xff] }
  0xb6   : > { %v478_v34 = vmul.f32 %v476_v13, %v1450_v53  ;;  %v806_v27 = vrot.slane %v780_v55, 4  ;;  %v1670_v33 = vrot.slane %v1431_v5, %v1229_v44  ;;  %v688_v40 = vrot.slane %v687_v30, 2 }
  0xb7   : > { %1125 = vst.msk [vmem:[%s1188_s17 + $0x12] ss:$8 sm:$0x3] %vm1191_vm0, %v1017_v58  ;;  %v592_v26 = vmul.f32 %v590_v23, %v1450_v53  ;;  %v809_v59 = vsel %vm282_vm1, %v805_v39, 0.0  ;;  %v682_v62 = vadd.f32 %v681_v48, %v680_v17  ;;  %v1671_v63 = vrot.slane %v1437_v32, %v1229_v44  ;;  %v1678_v23 = vld [vmem:[#allocation2_spill] sm:$0xff] }
  0xb8   : > { %v374_v36 = vadd.f32 %v1670_v33, %v353_v50  ;;  %v479_v60 = vadd.f32 %v478_v34, %v1515_v45  ;;  %v810_v6 = vrot.slane %v809_v59, 4  ;;  %v816_v1 = vsel %vm282_vm1, %v806_v27, 0.0 }
  0xb9   : > { %v593_v5 = vadd.f32 %v592_v26, %v1518_v51  ;;  %v689_v54 = vadd.f32 %v688_v40, %v687_v30  ;;  %v817_v37 = vrot.slane %v816_v1, 4  ;;  %v683_v29 = vrot.slane %v682_v62, 1  ;;  %v1679_v30 = vld [vmem:[#allocation3_spill] sm:$0xff] }
  0xba   : > { %379 = vst.msk [vmem:[%s1188_s17] ss:$8 sm:$0x3] %vm1191_vm0, %v374_v36  ;;  %v506_v14 = vadd.f32 %v504_v20, %v479_v60  ;;  %v811_v35 = vadd.f32 %v810_v6, %v809_v59  ;;  %v1672_v51 = vcombine.low %v1396_v47, %v1394_v9  ;;  %v1673_v9 = vld [vmem:[#allocation6_spill] sm:$0xff]  ;;  %v1677_v8 = vcombine.high %v1675_v43, %v1676_v49 }
  0xbb   : > { %v614_v45 = vadd.f32 %v1671_v63, %v593_v5  ;;  %v690_v61 = vrot.slane %v689_v54, 1  ;;  %v818_v4 = vadd.f32 %v817_v37, %v816_v1  ;;  %v684_v19 = vadd.f32 %v683_v29, %v682_v62 }
  0xbc   : > { %1116 = vst.msk [vmem:[%s1188_s17 + $0x1] ss:$8 sm:$0x3] %vm1191_vm0, %v506_v14  ;;  %1117 = vst.msk [vmem:[%s1188_s17 + $0x4] ss:$8 sm:$0x3] %vm1191_vm0, %v506_v14  ;;  %v703_v38 = vrot.slane %v1672_v51, %v1229_v44  ;;  %v1674_v47 = vcombine.low %v1404_v56, %v1673_v9  ;;  %v740_v2 = vrot.slane %v1677_v8, %v1229_v44 }
  0xbd   : > { %v812_v7 = vrot.slane %v811_v35, 2  ;;  %1118 = vst.msk [vmem:[%s1188_s17 + $0x2] ss:$8 sm:$0x3] %vm1191_vm0, %v614_v45  ;;  %v691_v32 = vadd.f32 %v690_v61, %v689_v54  ;;  %v819_v0 = vrot.slane %v818_v4, 2  ;;  %v1680_v39 = vcombine.high %v1678_v23, %v1679_v30 }
  0xbe   : > { %1119 = vst.msk [vmem:[%s1188_s17 + $0x10] ss:$8 sm:$0x3] %vm1191_vm0, %v614_v45  ;;  %v692_v10 = vmul.f32 0.083333336, %v684_v19  ;;  %v710_v21 = vrot.slane %v703_v38, %v1229_v44  ;;  %v834_v41 = vrot.slane %v1674_v47, %v1229_v44  ;;  %v747_v13 = vrot.slane %v740_v2, %v1229_v44 }
  0xbf   : > { %v813_v28 = vadd.f32 %v812_v7, %v811_v35  ;;  %v693_v16 = vmul.f32 0.083333336, %v691_v32  ;;  %v820_v42 = vadd.f32 %v819_v0, %v818_v4  ;;  %v881_v34 = vrot.slane %v1680_v39, %v1229_v44 }
  0xc0   : > { %v712_v12 = vmul.f32 %v710_v21, %v1419_v25  ;;  %v841_v58 = vrot.slane %v834_v41, %v1229_v44 }
  0xc1   : > { %v814_v31 = vrot.slane %v813_v28, 1  ;;  %v715_v46 = vcombine.low %v692_v10, %v693_v16  ;;  %v821_v18 = vrot.slane %v820_v42, 1  ;;  %v888_v36 = vrot.slane %v881_v34, %v1229_v44 }
  0xc2   : > { %v843_v20 = vmul.f32 %v841_v58, %v1419_v25 }
  0xc3   : > { %v815_v57 = vadd.f32 %v814_v31, %v813_v28  ;;  %v722_v22 = vrot.slane %v715_v46, %v1229_v44  ;;  %v822_v24 = vadd.f32 %v821_v18, %v820_v42 }
  0xc5   : > { %v823_v11 = vmul.f32 0.083333336, %v815_v57  ;;  %v729_v15 = vrot.slane %v722_v22, %v1229_v44  ;;  %v824_v52 = vmul.f32 0.083333336, %v822_v24 }
  0xc7   : > { %v731_v56 = vmul.f32 %v729_v15, %v1450_v53  ;;  %v846_v17 = vcombine.low %v823_v11, %v824_v52 }
  0xc9   : > { %v732_v55 = vadd.f32 %v731_v56, %v712_v12  ;;  %v853_v50 = vrot.slane %v846_v17, %v1229_v44 }
  0xcb   : > { %v749_v48 = vadd.f32 %v747_v13, %v732_v55  ;;  %v860_v27 = vrot.slane %v853_v50, %v1229_v44 }
  0xcd   : > { %1121 = vst.msk [vmem:[%s1188_s17 + $0x5] ss:$8 sm:$0x3] %vm1191_vm0, %v749_v48  ;;  %v862_v33 = vmul.f32 %v860_v27, %v1450_v53 }
  0xcf   : > { %v863_v26 = vadd.f32 %v862_v33, %v843_v20 }
  0xd1   : > { %v890_v40 = vadd.f32 %v888_v36, %v863_v26 }
  0xd3   : > { %1122 = vst.msk [vmem:[%s1188_s17 + $0x6] ss:$8 sm:$0x3] %vm1191_vm0, %v890_v40  ;;  %1123 = vst.msk [vmem:[%s1188_s17 + $0x11] ss:$8 sm:$0x3] %vm1191_vm0, %v890_v40 }
  0xd4 PF: > { %s12_s9 = sadd.s32 1, %s1153_s9  }
  0xd5   : > { %p9_p4 = scmp.ge.s32.totalorder %s12_s9, 4  }
  0xd7   :  { %11 = sbr.rel (!%p9_p4) target bundleno = 1 (0x1), region = 73 }

</bundles_post_ra>
